<compile_context>
chip_gen: v7x
topology: tpu7x:2x2x1
jax: 0.10.0
libtpu: 0.0.40
codegen_flags: <defaults>
</compile_context>

<pallas_src>
import jax
import jax.numpy as jnp
from jax.experimental import pallas as pl
from jax.experimental.pallas import tpu as pltpu


def _round_up(a: int, b: int) -> int:
    return (a + b - 1) // b * b


def _vmem_capacity_bytes() -> int:
    try:
        return int(pltpu.get_tpu_info().vmem_capacity_bytes)
    except Exception:
        return 64 << 20  # conservative (v7x-sized) fallback


def _make_corr2d_kernel(kh, kw, tile_h, wo_pad, has_halo):
    """Per-row-tile kernel body.

    Refs (in order):
      w_ref : (kh*kw,) flattened weights in SMEM (scalar-indexed)
      b_ref : (1,)     bias in SMEM
      x_ref : (tile_h, w_in_pad) input row tile in VMEM
      [halo_ref] : (halo8, w_in_pad) thin row halo (only when kh > 1)
      o_ref : (tile_h, wo_pad) lane-dense f32 output tile in VMEM
    """

    def kernel(w_ref, b_ref, *refs):
        if has_halo:
            x_ref, halo_ref, o_ref = refs
            # Thin halo: the concat temporary is only tile_h + halo8 rows.
            x = jnp.concatenate([x_ref[...], halo_ref[...]], axis=0)
        else:
            x_ref, o_ref = refs
            x = x_ref[...]

        # Fold the bias into the accumulator init (removes a full-tile VALU add).
        acc = jnp.full((tile_h, wo_pad), b_ref[0], dtype=jnp.float32)

        # Tiny static tap count -> unrolled shift-and-scale on the VPU.
        # TODO(synk): for Cin > 1 / batched inputs (reduction depth >= ~64),
        # switch to an im2col + jnp.dot MXU path; not worth it for kh*kw <= 9.
        for ki in range(kh):
            for kj in range(kw):
                acc = acc + x[ki:ki + tile_h, kj:kj + wo_pad] * w_ref[ki * kw + kj]

        o_ref[...] = acc

    return kernel


def conv2d_forward(x, weight, bias, *, tile_h=None):
    """Pallas TPU equivalent of Conv2D.forward(x) = corr2d(x, weight) + bias."""
    H, W = x.shape
    kh, kw = weight.shape
    Ho, Wo = H - kh + 1, W - kw + 1

    # ---- tiling -----------------------------------------------------------
    # Lane-dense output: last dim a multiple of 128 -> unmasked vector stores.
    wo_pad = _round_up(Wo, 128)
    # Input width must cover every column tap; keep it 128-aligned for clean DMA.
    w_in_pad = _round_up(wo_pad + kw - 1, 128)
    has_halo = kh > 1
    halo8 = _round_up(kh - 1, 8) if has_halo else 0

    vmem_cap = _vmem_capacity_bytes()
    # Per-block footprint cap: larger blocks on 128-MiB-VMEM chips (v5e/v6e),
    # tighter on v7x (64 MiB physical VMEM).
    block_cap = (8 << 20) if vmem_cap >= (100 << 20) else (2 << 20)

    if tile_h is None:
        rows_cap = max(8, (block_cap // (w_in_pad * 4)) // 8 * 8)
        tile_h = min(_round_up(Ho, 8), 512, rows_cap)
        # Megacore: make sure v7x's two TensorCores both get row blocks, but
        # only if each block stays >= ~1 MiB (DMA efficiency).
        if pl.cdiv(Ho, tile_h) == 1 and Ho > 8:
            half = _round_up(pl.cdiv(Ho, 2), 8)
            if half * w_in_pad * 4 >= (1 << 20):
                tile_h = half
    else:
        # Robustness: user tile_h must respect the (8,128) sublane constraint.
        tile_h = _round_up(max(int(tile_h), 8), 8)

    n_row_blocks = pl.cdiv(Ho, tile_h)
    ho_pad = n_row_blocks * tile_h
    h_total = ho_pad + halo8          # rows of padded input the kernel may touch
                                      # (>= H always, since halo8 >= kh-1)

    # ---- operands (zero padding never leaks into the sliced-out result) ----
    xf = x.astype(jnp.float32)
    if (h_total, w_in_pad) == (H, W):
        x_pad = xf                    # aligned case: skip the pad round trip
    else:
        x_pad = jnp.zeros((h_total, w_in_pad), jnp.float32).at[:H, :W].set(xf)

    w_flat = weight.reshape(-1).astype(jnp.float32)   # 1-D SMEM: 4*kh*kw bytes
    b = bias.reshape(-1).astype(jnp.float32)          # (1,)

    in_specs = [
        pl.BlockSpec(memory_space=pltpu.MemorySpace.SMEM),    # weights
        pl.BlockSpec(memory_space=pltpu.MemorySpace.SMEM),    # bias
        pl.BlockSpec((tile_h, w_in_pad), lambda i: (i, 0)),   # main row tile
    ]
    operands = [w_flat, b, x_pad]

    if has_halo:
        # Thin halo slab: only round_up(kh-1, 8) rows per tile, so every input
        # row is streamed from HBM once (a full-tile halo would read each row
        # twice and double the double-buffered input VMEM residency).
        x_halo = jnp.concatenate(
            [x_pad[(i + 1) * tile_h:(i + 1) * tile_h + halo8]
             for i in range(n_row_blocks)],
            axis=0)                                           # (n_rb*halo8, w_in_pad)
        in_specs.append(pl.BlockSpec((halo8, w_in_pad), lambda i: (i, 0)))
        operands.append(x_halo)

    kernel = _make_corr2d_kernel(kh, kw, tile_h, wo_pad, has_halo)

    # ---- explicit scoped-VMEM budget (double-buffered blocks + temporaries) --
    x_blk = tile_h * w_in_pad * 4
    halo_blk = halo8 * w_in_pad * 4
    o_blk = tile_h * wo_pad * 4
    concat_tmp = (tile_h + halo8) * w_in_pad * 4 if has_halo else 0
    needed = 2 * (x_blk + halo_blk + o_blk) + concat_tmp + o_blk
    vmem_limit = int(min(vmem_cap // 2, max(16 << 20, 2 * needed)))

    bytes_accessed = 4 * (ho_pad * w_in_pad
                          + n_row_blocks * halo8 * w_in_pad
                          + ho_pad * wo_pad)

    y_pad = pl.pallas_call(
        kernel,
        out_shape=jax.ShapeDtypeStruct((ho_pad, wo_pad), jnp.float32),
        grid_spec=pltpu.PrefetchScalarGridSpec(
            num_scalar_prefetch=0,
            grid=(n_row_blocks,),
            in_specs=in_specs,
            out_specs=pl.BlockSpec((tile_h, wo_pad), lambda i: (i, 0)),
        ),
        compiler_params=pltpu.CompilerParams(
            # Row tiles are independent -> megacore sharding on v7x; no-op on
            # single-TC v5e/v6e.
            dimension_semantics=("parallel",),
            vmem_limit_bytes=vmem_limit,
        ),
        cost_estimate=pl.CostEstimate(
            flops=2 * kh * kw * Ho * Wo,
            bytes_accessed=bytes_accessed,
            transcendentals=0,
        ),
    )(*operands)

    # Skip the output copy entirely when the padded result is already exact.
    if (ho_pad, wo_pad) == (Ho, Wo):
        return y_pad
    return y_pad[:Ho, :Wo]


def conv2d_reference(x, weight, bias):
    """Plain-JAX reference matching the PyTorch corr2d loop + bias."""
    kh, kw = weight.shape
    Ho, Wo = x.shape[0] - kh + 1, x.shape[1] - kw + 1
    out = jnp.zeros((Ho, Wo), jnp.float32)
    for ki in range(kh):
        for kj in range(kw):
            out = out + x[ki:ki + Ho, kj:kj + Wo] * weight[ki, kj]
    return out + bias[0]


if __name__ == "__main__":
    key = jax.random.PRNGKey(0)
    k1, k2, k3, k4 = jax.random.split(key, 4)

    def check(x, weight, bias, **kw):
        out = jax.block_until_ready(conv2d_forward(x, weight, bias, **kw))
        ref = conv2d_reference(x, weight, bias)
        assert out.shape == ref.shape, (out.shape, ref.shape)
        assert jnp.allclose(out, ref, atol=1e-5, rtol=1e-5), "mismatch vs reference"

    # 1) Shapes from the reference script: X is (6, 8), kernel_size = (1, 2),
    #    weight ~ torch.rand(kernel_size), bias = zeros(1).
    x = jax.random.normal(k1, (6, 8), dtype=jnp.float32)
    weight = jax.random.uniform(k2, (1, 2), dtype=jnp.float32)
    bias = jnp.zeros((1,), dtype=jnp.float32)
    check(x, weight, bias)

    # Also the fixed edge-detection kernel K = [[1, -1]] from the script.
    check(x, jnp.array([[1.0, -1.0]], dtype=jnp.float32), bias)

    # 2) kh > 1 exercises the thin-halo path.
    x2 = jax.random.normal(k3, (12, 10), dtype=jnp.float32)
    w2 = jax.random.uniform(k4, (3, 3), dtype=jnp.float32)
    b2 = jnp.full((1,), 0.25, dtype=jnp.float32)
    check(x2, w2, b2)

    # 3) Multiple row tiles (force tile_h=8): halo crossing tile boundaries.
    x3 = jax.random.normal(k1, (26, 9), dtype=jnp.float32)
    w3 = jax.random.uniform(k2, (3, 2), dtype=jnp.float32)
    check(x3, w3, b2, tile_h=8)

    # 4) Robustness: non-multiple-of-8 user tile (rounds up to 16).
    check(x3, w3, b2, tile_h=12)

    # 5) Fully aligned shape with a 1x1 kernel: pad and slice are skipped.
    x4 = jax.random.normal(k3, (128, 128), dtype=jnp.float32)
    w4 = jax.random.uniform(k4, (1, 1), dtype=jnp.float32)
    check(x4, w4, bias)

    print("KERNEL_OK")
</pallas_src>

<mosaic_0001>
module attributes {stable_mosaic.version = 11 : i64} {
  func.func @kernel(%arg0: i32, %arg1: memref<2xf32, #tpu.memory_space<smem>>, %arg2: memref<1xf32, #tpu.memory_space<smem>>, %arg3: memref<8x256xf32, #tpu.memory_space<vmem>>, %arg4: memref<8x128xf32, #tpu.memory_space<vmem>>) attributes {dimension_semantics = [#tpu.dimension_semantics<parallel>], iteration_bounds = array<i64: 1>, scalar_prefetch = 0 : i64, scratch_operands = 0 : i64, tpu.core_type = #tpu.core_type<tc>, window_params = [{transform_indices = @transform_0, window_bounds = array<i64: 2>}, {transform_indices = @transform_1, window_bounds = array<i64: 1>}, {transform_indices = @transform_2, window_bounds = array<i64: 8, 256>}, {transform_indices = @transform_3, window_bounds = array<i64: 8, 128>}]} {
    %c0 = arith.constant 0 : index
    %c0_0 = arith.constant 0 : index
    %0 = vector.load %arg3[%c0, %c0_0] : memref<8x256xf32, #tpu.memory_space<vmem>>, vector<8x256xf32>
    %c0_1 = arith.constant 0 : index
    %1 = memref.load %arg2[%c0_1] : memref<1xf32, #tpu.memory_space<smem>>
    %2 = vector.broadcast %1 : f32 to vector<8x128xf32>
    %3 = vector.extract_strided_slice %0 {offsets = [0, 0], sizes = [8, 128], strides = [1, 1]} : vector<8x256xf32> to vector<8x128xf32>
    %c0_2 = arith.constant 0 : index
    %4 = memref.load %arg1[%c0_2] : memref<2xf32, #tpu.memory_space<smem>>
    %5 = vector.broadcast %4 : f32 to vector<8x128xf32>
    %6 = arith.mulf %3, %5 : vector<8x128xf32>
    %7 = arith.addf %2, %6 : vector<8x128xf32>
    %8 = vector.extract_strided_slice %0 {offsets = [0, 1], sizes = [8, 128], strides = [1, 1]} : vector<8x256xf32> to vector<8x128xf32>
    %c1 = arith.constant 1 : index
    %9 = memref.load %arg1[%c1] : memref<2xf32, #tpu.memory_space<smem>>
    %10 = vector.broadcast %9 : f32 to vector<8x128xf32>
    %11 = arith.mulf %8, %10 : vector<8x128xf32>
    %12 = arith.addf %7, %11 : vector<8x128xf32>
    %c0_3 = arith.constant 0 : index
    %c0_4 = arith.constant 0 : index
    %13 = vector.load %arg4[%c0_3, %c0_4] : memref<8x128xf32, #tpu.memory_space<vmem>>, vector<8x128xf32>
    tpu.vector_store %arg4[%c0_3, %c0_4], %12 {strides = array<i32>} : memref<8x128xf32, #tpu.memory_space<vmem>>, vector<8x128xf32>,
    return
  }
  func.func @transform_0(%arg0: i32) -> i32 {
    %c0_i32 = arith.constant 0 : i32
    %c0_i32_0 = arith.constant 0 : i32
    return %c0_i32 : i32
  }
  func.func @transform_1(%arg0: i32) -> i32 {
    %c0_i32 = arith.constant 0 : i32
    %c0_i32_0 = arith.constant 0 : i32
    return %c0_i32 : i32
  }
  func.func @transform_2(%arg0: i32) -> (i32, i32) {
    %c0_i32 = arith.constant 0 : i32
    %c0_i32_0 = arith.constant 0 : i32
    return %arg0, %c0_i32 : i32, i32
  }
  func.func @transform_3(%arg0: i32) -> (i32, i32) {
    %c0_i32 = arith.constant 0 : i32
    %c0_i32_0 = arith.constant 0 : i32
    return %arg0, %c0_i32 : i32, i32
  }
}

</mosaic_0001>

<bundles_post_ra>
// kernel: tpu_custom_call.1
= control target key start
LH: loop header
LB: loop body
LE: loop exit
PB: predicated region body
PF: predicated region fallthrough
CT: control target
= control target key end

     0   :  { %9 = vsyncpa [#allocation6], 0  ;;  %s201_s0 = inlined_call_operand.vmem [shape: f32[2], index: 0, kind: input, shape index: {}]   ;;  %s202_s1 = inlined_call_operand.<no memory space> [shape: f32[1], index: 1, kind: input, shape index: {}]   ;;  %s203_s2 = inlined_call_operand.hbm [shape: f32[8,256], index: 2, kind: input, shape index: {}]   ;;  %s204_s3 = inlined_call_operand.hbm [shape: f32[8,128], index: 3, kind: output, shape index: {}]  }
   0x1   :  { %10 = vsyncpa [#allocation4], 0 }
   0x2   :  { %11 = vsyncpa [#allocation5], 0  ;;  %s18_s14 = sshll.u32 %s201_s0, 4  ;;  %s19_s14 = int_to_ptr.vmem [resolvable:$true] %s18_s14 }
   0x3   :  { %s85_s15 = scalar_lea.vmem %s19_s14, 16  ;;  %p90_p1 = scmp.lt.s32.totalorder %s19_s14, %s19_s14 }
   0x4   :  { %p86_p0 = scmp.ne.s32.totalorder %s19_s14, %s85_s15  ;;  %p91_p2 = scmp.lt.s32.totalorder %s85_s15, %s85_s15 }
   0x6   :  { %p92_p3 = por %p91_p2, %p90_p1 }
   0x8   :  { %p93_p4 = pnand %p92_p3, %p86_p0 }
   0xa   :  { %96 = shalt.err (!%p93_p4)
}
   0xb   :  { %s147_s16 = smov [#allocation3]   ;;  %s148_s17 = smov [#allocation7]  }
   0xc   :  { %21 = dma.vmem_to_smem %s19_s14, 16, %s147_s16, [#allocation6]  }
   0xd   :  { %s30_s18 = sshll.u32 %s148_s17, 4  ;;  %s97_s21 = scalar_lea.hbm %s203_s2, 256  ;;  %s31_s18 = int_to_ptr.vmem [resolvable:$true] %s30_s18 }
   0xe   :  { %p98_p5 = scmp.ne.s32.totalorder %s203_s2, %s97_s21  ;;  %p101_p6 = scmp.lt.u32.totalorder %s97_s21, %s203_s2 }
  0x10   :  { %p103_p7 = pnand %p101_p6, %p98_p5 }
  0x12   :  { %106 = shalt.err (!%p103_p7)
}
  0x13   :  { %s107_s25 = scalar_lea.vmem %s31_s18, 256  ;;  %p112_p9 = scmp.lt.s32.totalorder %s31_s18, %s31_s18 }
  0x14   :  { %p108_p8 = scmp.ne.s32.totalorder %s31_s18, %s107_s25  ;;  %p113_p10 = scmp.lt.s32.totalorder %s107_s25, %s107_s25 }
  0x16   :  { %p114_p11 = por %p113_p10, %p112_p9 }
  0x18   :  { %p115_p12 = pnand %p114_p11, %p108_p8 }
  0x1a   :  { %118 = shalt.err (!%p115_p12)
}
  0x1b   :  { %33 = dma.hbm_to_vmem [thread:$0]  %s203_s2, 256, %s31_s18, [#allocation4]  }
  0x1c   :  { %141 = dma.done.wait [#allocation6], 16  }
  0x1d   :  { %142 = vsyncadd [#allocation6], 4294967280 }
  0x1e   :  { %143 = dma.done.wait [#allocation4], 256  }
  0x1f   :  { %144 = vsyncadd [#allocation4], 4294967040 }
  0x20   :  { %40 = sfence }
  0x21   :  { %s80_s28 = sld [smem:[#allocation3 + $0x1]]  ;;  %v41_v0 = vld [vmem:[#allocation7] sm:$0xff]  ;;  %v42_v1 = vld [vmem:[#allocation7 + $0x8] sm:$0xff]  ;;  %s149_s29 = smov 127   ;;  %v44_v7 = vstv %s202_s1  ;;  %vm59_vm0 = vcmask 1039360  }
  0x22   :  { %s45_s30 = sld [smem:[#allocation3]]  ;;  %s150_s2 = smov [#allocation8]  }
  0x23   :  { %s70_s6 = sshll.u32 %s150_s2, 4  ;;  %s71_s6 = int_to_ptr.vmem [resolvable:$true] %s70_s6 }
  0x24   :  { %s119_s7 = scalar_lea.vmem %s71_s6, 128  ;;  %p124_p0 = scmp.lt.s32.totalorder %s71_s6, %s71_s6 }
  0x25   :  { %p120_p13 = scmp.ne.s32.totalorder %s71_s6, %s119_s7  ;;  %p125_p1 = scmp.lt.s32.totalorder %s119_s7, %s119_s7 }
  0x27   :  { %v50_v2 = vstv %s80_s28  ;;  %p126_p2 = por %p125_p1, %p124_p0 }
  0x28   :  { %v51_v3 = vmul.f32 %v50_v2, %v41_v0  ;;  %v52_v4 = vmul.f32 %v50_v2, %v42_v1  ;;  %v46_v5 = vstv %s45_s30 }
  0x29   :  { %v47_v6 = vmul.f32 %v46_v5, %v41_v0  ;;  %p127_p3 = pnand %p126_p2, %p120_p13 }
  0x2a   :  { %55 = vrot.lane.b32.xlu0 %v51_v3, %s149_s29 }
  0x2b   :  { %v48_v9 = vadd.f32 %v47_v6, %v44_v7 }
  0x2e   :  { %57 = vrot.lane.b32.xlu0 %v52_v4, %s149_s29 }
  0x9c   :  { %v56_v8 = vpop.permute.xlu0 %55 }
  0xa0   :  { %v58_v10 = vpop.permute.xlu0 %57 }
  0xa1   :  { %v60_v11 = vsel %vm59_vm0, %v56_v8, %v58_v10 }
  0xa2   :  { %v62_v12 = vadd.f32 %v60_v11, %v48_v9 }
  0xa4   :  { %63 = vst [vmem:[#allocation8] sm:$0xff] %v62_v12 }
  0xa5   :  { %130 = shalt.err (!%p127_p3)
}
  0xa6   :  { %s131_s1 = scalar_lea.hbm %s204_s3, 128 }
  0xa7   :  { %p132_p4 = scmp.ne.s32.totalorder %s204_s3, %s131_s1  ;;  %p135_p5 = scmp.lt.u32.totalorder %s131_s1, %s204_s3 }
  0xa9   :  { %p137_p6 = pnand %p135_p5, %p132_p4 }
  0xab   :  { %140 = shalt.err (!%p137_p6)
}
  0xac   :  { %73 = dma.vmem_to_hbm [thread:$0]  %s71_s6, 128, %s204_s3, [#allocation5]  }
  0xad   :  { %145 = dma.done.wait [#allocation5], 128  }
  0xae   :  { %146 = vsyncadd [#allocation5], 4294967168 }
  0xaf   :  { %77 = vsyncpa [#allocation4], 1 }
  0xb0   :  { %78 = vsyncpa [#allocation5], 1 }
  0xb1   :  { %79 = vsyncpa [#allocation6], 1 }

</bundles_post_ra>
